<compile_context>
chip_gen: v6e
topology: v6e:2x2x1
jax: 0.10.0
libtpu: 0.0.40
codegen_flags: <defaults>
</compile_context>

<pallas_src>
import functools

import jax
import jax.numpy as jnp
from jax.experimental import pallas as pl
from jax.experimental.pallas import tpu as pltpu


def _rmsnorm_kernel(x_ref, w_ref, o_ref, *, eps, inv_d):
    """RMS-normalize one (tm, D) stripe of rows and scale by the weight."""
    x = x_ref[...].astype(jnp.float32)                      # (tm, D)
    ss = jnp.sum(x * x, axis=-1, keepdims=True)             # (tm, 1) XLU reduce
    inv = jax.lax.rsqrt(ss * inv_d + eps)                   # EUP rsqrt, mean folded in
    o_ref[...] = (x * inv * w_ref[...]).astype(o_ref.dtype)


def _round_up(n, m):
    return ((n + m - 1) // m) * m


def _vmem_capacity_bytes():
    """Physical VMEM per TensorCore; conservative fallback if query fails."""
    try:
        return int(pltpu.get_tpu_info().vmem_capacity_bytes)
    except Exception:
        return 64 * 1024 * 1024  # v7x has the smallest VMEM (64 MiB)


def _choose_tm(M, D, itemsize, tile_budget_bytes):
    # dtype-native sublane packing: 8 rows (f32), 16 (bf16), 32 (int8/fp8).
    pack = 8 * max(1, 4 // itemsize)
    # Per-row VMEM bytes: double-buffered input + output (native dtype) plus
    # ~2 f32-wide temporaries inside the kernel body.
    per_row = D * (4 * itemsize + 2 * 4)
    tm = max(pack, (tile_budget_bytes // per_row) // pack * pack)
    tm = min(tm, 2048)  # amortization plateau for streaming kernels
    # Keep >= 2 grid steps whenever M allows it (v7x has 2 TensorCores);
    # costs one extra ~0.35us grid step on v5e/v6e, which is negligible.
    tm = min(tm, max(pack, _round_up((M + 1) // 2, pack)))
    return tm


@functools.partial(jax.jit, static_argnames=("eps", "tm"))
def gemma_rms_norm(x, weight, *, eps=1e-6, tm=None):
    """y = x * rsqrt(mean(x^2, -1, keepdims=True) + eps) * weight."""
    orig_shape = x.shape
    D = orig_shape[-1]
    M = 1
    for s in orig_shape[:-1]:
        M *= s

    x2d = x.reshape(M, D)
    w2d = weight.astype(jnp.float32).reshape(1, D)  # pre-cast once, resident

    itemsize = jnp.dtype(x.dtype).itemsize
    vmem_phys = _vmem_capacity_bytes()
    vmem_limit = int(vmem_phys * 3) // 4   # scoped limit handed to the compiler
    tile_budget = int(vmem_phys) // 2      # what tile selection may consume
    if tm is None:
        tm = _choose_tm(M, D, itemsize, tile_budget)

    # No padding and no trailing slice: let Pallas mask the partial last block.
    grid = (pl.cdiv(M, tm),)

    out2d = pl.pallas_call(
        functools.partial(_rmsnorm_kernel, eps=eps, inv_d=1.0 / D),
        out_shape=jax.ShapeDtypeStruct((M, D), x.dtype),
        grid_spec=pltpu.PrefetchScalarGridSpec(
            num_scalar_prefetch=0,
            grid=grid,
            in_specs=[
                pl.BlockSpec((tm, D), lambda i: (i, 0)),   # activation stripe
                pl.BlockSpec((1, D), lambda i: (0, 0)),    # weight (resident)
            ],
            out_specs=pl.BlockSpec((tm, D), lambda i: (i, 0)),
        ),
        compiler_params=pltpu.CompilerParams(
            dimension_semantics=("parallel",),
            vmem_limit_bytes=vmem_limit,
        ),
    )(x2d, w2d)

    return out2d.reshape(orig_shape)


if __name__ == "__main__":
    # Small synthetic config: batch=2, seq=9, dim=256.
    # M = 18 rows -> 2 grid steps with a partial last block (exercises masking).
    B, S, D = 2, 9, 256
    eps = 1e-6

    key = jax.random.PRNGKey(0)
    k_x, k_w = jax.random.split(key, 2)

    x = jax.random.normal(k_x, (B, S, D), dtype=jnp.float32)
    # The module initializes weight to zeros; use random values so the
    # elementwise scale is actually exercised by the check.
    weight = jax.random.normal(k_w, (D,), dtype=jnp.float32) * 0.1

    out = gemma_rms_norm(x, weight, eps=eps)
    out = jax.block_until_ready(out)

    # Reference (matches the spec module): x * rsqrt(mean(x^2,-1)+eps) * weight
    ref = x * jax.lax.rsqrt(jnp.mean(x * x, axis=-1, keepdims=True) + eps) * weight

    assert out.shape == (B, S, D)
    assert jnp.allclose(out, ref, atol=1e-5, rtol=1e-5)

    print("KERNEL_OK")
</pallas_src>

<mosaic_0001>
module attributes {stable_mosaic.version = 11 : i64} {
  func.func @_rmsnorm_kernel(%arg0: i32, %arg1: memref<16x256xf32, #tpu.memory_space<vmem>>, %arg2: memref<1x256xf32, #tpu.memory_space<vmem>>, %arg3: memref<16x256xf32, #tpu.memory_space<vmem>>) attributes {dimension_semantics = [#tpu.dimension_semantics<parallel>], iteration_bounds = array<i64: 2>, scalar_prefetch = 0 : i64, scratch_operands = 0 : i64, tpu.core_type = #tpu.core_type<tc>, window_params = [{transform_indices = @transform_0, window_bounds = array<i64: 16, 256>}, {pipeline_mode = #tpu.pipeline_mode<synchronous>, transform_indices = @transform_1, window_bounds = array<i64: 1, 256>}, {transform_indices = @transform_2, window_bounds = array<i64: 16, 256>}]} {
    %c0 = arith.constant 0 : index
    %c0_0 = arith.constant 0 : index
    %0 = vector.load %arg1[%c0, %c0_0] : memref<16x256xf32, #tpu.memory_space<vmem>>, vector<16x256xf32>
    %1 = arith.mulf %0, %0 : vector<16x256xf32>
    %cst = arith.constant dense<0.000000e+00> : vector<16xf32>
    %2 = vector.multi_reduction <add>, %1, %cst [1] : vector<16x256xf32> to vector<16xf32>
    %3 = vector.shape_cast %2 : vector<16xf32> to vector<16x1xf32>
    %cst_1 = arith.constant 3.906250e-03 : f32
    %4 = vector.broadcast %cst_1 : f32 to vector<16x1xf32>
    %5 = arith.mulf %3, %4 : vector<16x1xf32>
    %cst_2 = arith.constant 9.99999997E-7 : f32
    %6 = vector.broadcast %cst_2 : f32 to vector<16x1xf32>
    %7 = arith.addf %5, %6 : vector<16x1xf32>
    %8 = math.rsqrt %7 : vector<16x1xf32>
    %9 = vector.broadcast %8 : vector<16x1xf32> to vector<16x256xf32>
    %10 = arith.mulf %0, %9 : vector<16x256xf32>
    %c0_3 = arith.constant 0 : index
    %c0_4 = arith.constant 0 : index
    %11 = vector.load %arg2[%c0_3, %c0_4] : memref<1x256xf32, #tpu.memory_space<vmem>>, vector<1x256xf32>
    %12 = vector.broadcast %11 : vector<1x256xf32> to vector<16x256xf32>
    %13 = arith.mulf %10, %12 : vector<16x256xf32>
    %c0_5 = arith.constant 0 : index
    %c0_6 = arith.constant 0 : index
    %14 = vector.load %arg3[%c0_5, %c0_6] : memref<16x256xf32, #tpu.memory_space<vmem>>, vector<16x256xf32>
    tpu.vector_store %arg3[%c0_5, %c0_6], %13 {strides = array<i32>} : memref<16x256xf32, #tpu.memory_space<vmem>>, vector<16x256xf32>,
    return
  }
  func.func @transform_0(%arg0: i32) -> (i32, i32) {
    %c0_i32 = arith.constant 0 : i32
    %c0_i32_0 = arith.constant 0 : i32
    return %arg0, %c0_i32 : i32, i32
  }
  func.func @transform_1(%arg0: i32) -> (i32, i32) {
    %c0_i32 = arith.constant 0 : i32
    %c0_i32_0 = arith.constant 0 : i32
    %c0_i32_1 = arith.constant 0 : i32
    return %c0_i32, %c0_i32_0 : i32, i32
  }
  func.func @transform_2(%arg0: i32) -> (i32, i32) {
    %c0_i32 = arith.constant 0 : i32
    %c0_i32_0 = arith.constant 0 : i32
    return %arg0, %c0_i32 : i32, i32
  }
}

</mosaic_0001>

<bundles_post_ra>
// kernel: gemma_rms_norm.1
= control target key start
LH: loop header
LB: loop body
LE: loop exit
PB: predicated region body
PF: predicated region fallthrough
CT: control target
= control target key end

     0   :  { %s610_s9 = smov 0   ;;  %s612_s10 = smov 0   ;;  %s717_s0 = inlined_call_operand.vmem [shape: f32[18,256], index: 0, kind: input, shape index: {}]   ;;  %s718_s1 = inlined_call_operand.vmem [shape: f32[1,256], index: 1, kind: input, shape index: {}]   ;;  %s719_s2 = inlined_call_operand.vmem [shape: f32[18,256], index: 2, kind: output, shape index: {}]  }
   0x1   :  { %s614_s11 = smov 0  }
   0x2 LB: > { %s623_s12 = sadd.s32 4294967295, %s561_s11   ;;  %s625_s13 = sadd.s32 1, %s561_s11   ;;  %s561_s11 = sphi %s614_s11, %s726_s11   ;;  %s557_s10 = sphi %s612_s10, %s725_s10   ;;  %s553_s9 = sphi %s610_s9, %s724_s9  }
   0x3   : > { %s63_s14 = ssub.s32 %s561_s11, %s625_s13  ;;  %s66_s15 = sadd.s32 1, %s557_s10 }
   0x4   : > { %p64_p0 = scmp.eq.s32.totalorder %s63_s14, 0  ;;  %p76_p1 = scmp.ne.s32.totalorder %s557_s10, %s553_s9 }
   0x5   : > { %p77_p2 = scmp.eq.s32.totalorder %s623_s12, 1  ;;  %p385_p3 = scmp.ge.s32.totalorder %s561_s11, 1 }
   0x6   : > { %s633_s16 = scalar_select %p64_p0, %s557_s10, %s66_s15  }
   0x7   : > { %p635_p4 = por %p77_p2, %p76_p1  ;;  %p124_p5 = scmp.lt.s32.totalorder %s561_s11, 3 }
   0x9   : > { %p125_p6 = pnand %p385_p3, %p124_p5 }
   0xa   : > { %s640_s18 = sshll.u32 (!%p125_p6), %s623_s12, 1  ;;  %s148_s26 = sand.u32 (!%p125_p6), 1, %s553_s9  }
   0xb   : > { %128 = sbr.rel (%p125_p6) target bundleno = 229 (0xe5), region = 28  ;;  %p157_p7 = scmp.lt.s32.totalorder (!%p125_p6), %s640_s18, 2 }
   0xc   : > { %s386_s27 = sshll.u32 (!%p125_p6), %s148_s26, 5 }
   0xd   : > { %s651_s28 = scalar_lea.vmem (!%p125_p6), [#allocation2], %s386_s27  }
  0x10   : > { %s158_s19 = scalar_select %p157_p7, %s640_s18, 2  ;;  %v200_v14 = vlaneseq  ;;  %v198_v20 = vld [vmem:[%s718_s1] sm:$0x3] }
  0x11   : > { %s226_s29 = ssub.s32 (%p635_p4), 3, %s640_s18  ;;  %s412_s30 = sshll.u32 (%p635_p4), %s623_s12, 5 }
  0x12   : > { %s409_s20 = sshll.u32 %s158_s19, 4  ;;  %v201_v17 = vshrl.u32 %v200_v14, 7  ;;  %p227_p8 = scmp.lt.s32.totalorder (%p635_p4), %s226_s29, 2 }
  0x13   : > { %s161_s23 = scalar_lea.vmem %s717_s0, %s409_s20  ;;  %s664_s5 = scalar_lea.vmem (%p635_p4), %s719_s2, %s412_s30  }
  0x14   : > { %v174_v0 = vld [vmem:[%s161_s23] sm:$0xff]  ;;  %v175_v1 = vld [vmem:[%s161_s23 + $0x8] sm:$0xff]  ;;  %v176_v2 = vld [vmem:[%s161_s23 + $0x10] sm:$0xff]  ;;  %v202_v18 = vsub.s32 0, %v201_v17  ;;  %v206_v19 = vsub.s32 1, %v201_v17 }
  0x15   : > { %v178_v3 = vmul.f32 %v174_v0, %v174_v0  ;;  %v179_v4 = vmul.f32 %v175_v1, %v175_v1  ;;  %v177_v5 = vld [vmem:[%s161_s23 + $0x18] sm:$0xff]  ;;  %v180_v6 = vmul.f32 %v176_v2, %v176_v2 }
  0x16   : > { %v181_v7 = vmul.f32 %v177_v5, %v177_v5  ;;  %v203_v21 = vrot.slane %v198_v20, %v202_v18  ;;  %v207_v22 = vrot.slane %v198_v20, %v206_v19 }
  0x17   : > { %v182_v8 = vadd.f32 %v179_v4, %v178_v3 }
  0x18   : > { %v185_v9 = vadd.f32 %v181_v7, %v180_v6 }
  0x19   : > { %183 = vadd.xlane.f32.xlu0 %v182_v8 }
  0x1d   : > { %186 = vadd.xlane.f32.xlu0 %v185_v9 }
  0xa2   : > { %v184_v10 = vpop.xlane.xlu0 %183 }
  0xa3   : > { %v188_v11 = vmul.f32 0.00390625, %v184_v10 }
  0xa5   : > { %v190_v12 = vadd.f32 1e-06, %v188_v11 }
  0xa6   : > { %v187_v13 = vpop.xlane.xlu0 %186 }
  0xa7   : > { %503 = vrsqrt.f32 %v190_v12  ;;  %v189_v15 = vmul.f32 0.00390625, %v187_v13 }
  0xa9   : > { %v191_v16 = vadd.f32 1e-06, %v189_v15 }
  0xab   : > { %505 = vrsqrt.f32 %v191_v16 }
  0xb4   : > { %v504_v23 = vpop.eup %503 }
  0xb5   : > { %v194_v24 = vmul.f32 %v504_v23, %v174_v0  ;;  %v195_v25 = vmul.f32 %v504_v23, %v175_v1 }
  0xb7   : > { %v210_v26 = vmul.f32 %v203_v21, %v194_v24  ;;  %v211_v27 = vmul.f32 %v207_v22, %v195_v25 }
  0xb8   : > { %v506_v28 = vpop.eup %505 }
  0xb9   : > { %214 = vst [vmem:[%s651_s28] sm:$0xff] %v210_v26  ;;  %215 = vst [vmem:[%s651_s28 + $0x8] sm:$0xff] %v211_v27  ;;  %v196_v29 = vmul.f32 %v506_v28, %v176_v2  ;;  %v197_v30 = vmul.f32 %v506_v28, %v177_v5  ;;  %224 = sbr.rel (!%p635_p4) target bundleno = 229 (0xe5), region = 32 }
  0xbb   : > { %v212_v31 = vmul.f32 %v203_v21, %v196_v29  ;;  %v213_v32 = vmul.f32 %v207_v22, %v197_v30 }
  0xbd   : > { %216 = vst [vmem:[%s651_s28 + $0x10] sm:$0xff] %v212_v31  ;;  %217 = vst [vmem:[%s651_s28 + $0x18] sm:$0xff] %v213_v32 }
  0xbe   : > { %s728_s29 = smov (!%p227_p8, %s226_s29), 2 }
  0xbf   : > { %s410_s6 = sshll.u32 %s728_s29, 8 }
  0xc0   : > { %p397_p9 = scmp.eq.s32.totalorder %s410_s6, 0 }
  0xc1   : > { %s670_s7 = sshrl.u32 (!%p397_p9), %s728_s29, 1 }
  0xc2   : > { %237 = sbr.rel (%p397_p9) target bundleno = 229 (0xe5), region = 36  ;;  %p398_p10 = scmp.le.s32.totalorder (!%p397_p9), %s670_s7, 0 }
  0xc7   : > { %338 = sbr.rel (%p398_p10) target bundleno = 212 (0xd4), region = 84  ;;  %s721_s8 = smov (!%p398_p10), %s664_s5 }
  0xc8   : > { %s722_s9 = smov (!%p398_p10), %s651_s28  ;;  %s679_s11 = smov (!%p398_p10), 0  }
  0xc9   : > { %s575_s12 = smov (!%p398_p10), 0  }
  0xcc LB: >> { %v250_v33 = vld [vmem:[%s569_s9] sm:$0xff]  ;;  %v252_v34 = vld [vmem:[%s569_s9 + $0x10] sm:$0xff]  ;;  %v254_v35 = vld [vmem:[%s569_s9 + $0x8] sm:$0xff]  ;;  %s258_s14 = sadd.s32 1, %s573_s11  ;;  %s244_s12 = sadd.s32 1, %s577_s12   ;;  %s577_s12 = sphi %s575_s12, %s244_s12   ;;  %s573_s11 = sphi %s679_s11, %s723_s11   ;;  %s569_s9 = sphi %s722_s9, %s263_s9   ;;  %s565_s8 = sphi %s721_s8, %s264_s8  }
  0xcd   : >> { %251 = vst [vmem:[%s565_s8] sm:$0xff] %v250_v33  ;;  %253 = vst [vmem:[%s565_s8 + $0x10] sm:$0xff] %v252_v34  ;;  %v256_v36 = vld [vmem:[%s569_s9 + $0x18] sm:$0xff]  ;;  %p259_p11 = scmp.ge.s32.totalorder %s258_s14, %s670_s7  ;;  %p243_p12 = scmp.ge.s32.totalorder %s244_s12, %s670_s7 }
  0xce   : >> { %255 = vst [vmem:[%s565_s8 + $0x8] sm:$0xff] %v254_v35  ;;  %257 = vst [vmem:[%s565_s8 + $0x18] sm:$0xff] %v256_v36 }
  0xcf   : >> { %s730_s14 = smov (%p259_p11, %s258_s14), 0  ;;  %246 = sbr.rel (!%p243_p12) target bundleno = 204 (0xcc), region = 90 }
  0xd0   : >> { %s399_s15 = sshll.u32 %s730_s14, 5  ;;  %s723_s11 = smov %s730_s14 }
  0xd1   : >> { %s263_s9 = scalar_lea.vmem %s651_s28, %s399_s15 [#allocation2]   ;;  %s264_s8 = scalar_lea.vmem %s664_s5, %s399_s15  }
  0xd4 PF: > { %s695_s17 = sand.u32 1, %s728_s29   ;;  %s413_s18 = sshll.u32 %s670_s7, 5 }
  0xd5   : > { %s699_s19 = scalar_lea.vmem %s651_s28, %s413_s18 [#allocation2]   ;;  %s271_s20 = scalar_lea.vmem %s664_s5, %s413_s18  }
  0xd6   : > { %p404_p13 = scmp.le.s32.totalorder %s695_s17, 0 }
  0xd7   : > { %s579_s21 = smov (!%p404_p13), %s271_s20   ;;  %s583_s22 = smov (!%p404_p13), %s699_s19  }
  0xd8   : > { %352 = sbr.rel (%p404_p13) target bundleno = 229 (0xe5), region = 95  ;;  %s587_s23 = smov (!%p404_p13), 0  }
  0xd9   : > { %s591_s24 = smov (!%p404_p13), 0  }
  0xdd LB: >> { %v281_v37 = vld [vmem:[%s585_s22] sm:$0xff]  ;;  %v283_v38 = vld [vmem:[%s585_s22 + $0x8] sm:$0xff]  ;;  %s285_s25 = sadd.s32 1, %s589_s23  ;;  %s275_s24 = sadd.s32 1, %s593_s24   ;;  %s593_s24 = sphi %s591_s24, %s275_s24   ;;  %s589_s23 = sphi %s587_s23, %s588_s23   ;;  %s585_s22 = sphi %s583_s22, %s290_s22   ;;  %s581_s21 = sphi %s579_s21, %s291_s21  }
  0xde   : >> { %282 = vst [vmem:[%s581_s21] sm:$0xff] %v281_v37  ;;  %284 = vst [vmem:[%s581_s21 + $0x8] sm:$0xff] %v283_v38  ;;  %p286_p0 = scmp.ge.s32.totalorder %s285_s25, %s695_s17  ;;  %p274_p1 = scmp.ge.s32.totalorder %s275_s24, %s695_s17 }
  0xe0   : >> { %s732_s25 = smov (%p286_p0, %s285_s25), 0  ;;  %277 = sbr.rel (!%p274_p1) target bundleno = 221 (0xdd), region = 101 }
  0xe1   : >> { %s405_s26 = sshll.u32 %s732_s25, 4  ;;  %s588_s23 = smov %s732_s25  }
  0xe2   : >> { %s290_s22 = scalar_lea.vmem %s699_s19, %s405_s26 [#allocation2]   ;;  %s291_s21 = scalar_lea.vmem %s271_s20, %s405_s26  }
  0xe5 PF: > { %p9_p2 = scmp.ge.s32.totalorder %s625_s13, 4   ;;  %s724_s9 = smov %s557_s10 }
  0xe6   : > { %s725_s10 = smov %s633_s16  ;;  %s726_s11 = smov %s625_s13 }
  0xe7   :  { %11 = sbr.rel (!%p9_p2) target bundleno = 2 (0x2), region = 112 }

</bundles_post_ra>
